<compile_context>
chip_gen: v6e
topology: v6e:2x2x1
jax: 0.10.0
libtpu: 0.0.40
codegen_flags: <defaults>
</compile_context>

<pallas_src>
import functools

import jax
import jax.numpy as jnp
from jax.experimental import pallas as pl
from jax.experimental.pallas import tpu as pltpu


# ----------------------------- Pallas kernel -------------------------------

def _hbm_copy_kernel(num_tables, *refs):
    """Pure HBM->HBM identity copy: one async DMA per table, all in flight."""
    in_refs = refs[:num_tables]
    out_refs = refs[num_tables:2 * num_tables]
    sem = refs[2 * num_tables]
    # Start every copy before waiting on any, so all DMAs stream concurrently.
    for i in range(num_tables):
        pltpu.make_async_copy(in_refs[i], out_refs[i], sem.at[i]).start()
    for i in range(num_tables):
        pltpu.make_async_copy(in_refs[i], out_refs[i], sem.at[i]).wait()


def materialize_embeddings(tables):
    """One fused Pallas call that DMA-copies a list of [N, D] tables HBM->HBM."""
    num_tables = len(tables)
    if num_tables == 0:
        return []

    # Zero-sized tables pass through unchanged (nothing to copy).
    nonempty = [i for i, t in enumerate(tables) if t.size > 0]
    if len(nonempty) < num_tables:
        outs = list(tables)
        for i, o in zip(nonempty,
                        materialize_embeddings([tables[i] for i in nonempty])):
            outs[i] = o
        return outs

    total_bytes = int(sum(t.size * jnp.dtype(t.dtype).itemsize for t in tables))

    outs = pl.pallas_call(
        functools.partial(_hbm_copy_kernel, num_tables),
        out_shape=tuple(jax.ShapeDtypeStruct(t.shape, t.dtype) for t in tables),
        # Raw HBM refs on both sides: no auto-DMA, no VMEM staging, no grid.
        in_specs=[pl.BlockSpec(memory_space=pl.ANY) for _ in range(num_tables)],
        out_specs=tuple(pl.BlockSpec(memory_space=pl.ANY)
                        for _ in range(num_tables)),
        scratch_shapes=[pltpu.SemaphoreType.DMA((num_tables,))],
        cost_estimate=pl.CostEstimate(
            flops=0, transcendentals=0, bytes_accessed=2 * total_bytes),
    )(*tables)

    if not isinstance(outs, (tuple, list)):   # defensive: single-output case
        outs = (outs,)
    return list(outs)


# --------------------------- Module in JAX ----------------------------------

def _xavier_uniform(key, shape, gain, dtype=jnp.float32):
    # Matches torch.nn.init.xavier_uniform_ for a 2-D [N, D] tensor:
    #   fan_out = N, fan_in = D.
    fan_out, fan_in = shape
    bound = gain * jnp.sqrt(6.0 / (fan_in + fan_out))
    return jax.random.uniform(key, shape, dtype=dtype, minval=-bound, maxval=bound)


class RelGraphEmbed:
    """JAX/Pallas port of the featureless-heterograph embedding layer."""

    def __init__(self, ntype_num_nodes, embed_size, key,
                 embed_name="embed", activation=None, dropout=0.0):
        # `activation` / `dropout` mirror the reference constructor; the
        # reference forward() never applies them, so neither do we.
        self.embed_size = embed_size
        self.embed_name = embed_name
        self.activation = activation
        self.dropout = dropout
        self.embeds = {}
        gain = 2.0 ** 0.5  # nn.init.calculate_gain('relu')
        for i, (ntype, n_nodes) in enumerate(sorted(ntype_num_nodes.items())):
            k = jax.random.fold_in(key, i)
            self.embeds[ntype] = _xavier_uniform(k, (n_nodes, embed_size), gain)

    def forward(self, block=None):
        # TODO(synk): `block` (DGL heterograph block) has no Pallas equivalent;
        # with block=None the reference forward just returns the embedding dict.
        ntypes = list(self.embeds.keys())
        outs = materialize_embeddings([self.embeds[nt] for nt in ntypes])
        return dict(zip(ntypes, outs))


# ------------------------------ Demo / test ----------------------------------

if __name__ == "__main__":
    key = jax.random.PRNGKey(0)

    # Small synthetic heterograph: node-type -> number of nodes.
    ntype_num_nodes = {"user": 16, "item": 24, "tag": 8}
    embed_size = 32

    model = RelGraphEmbed(ntype_num_nodes, embed_size, key)
    out = model.forward()

    # Block on all results and verify identity semantics vs. the parameters.
    out = jax.tree_util.tree_map(jax.block_until_ready, out)
    for ntype, n_nodes in ntype_num_nodes.items():
        assert out[ntype].shape == (n_nodes, embed_size)
        assert out[ntype].dtype == jnp.float32
        assert bool(jnp.allclose(out[ntype], model.embeds[ntype]))

    print("KERNEL_OK")
</pallas_src>

<mosaic_0001>
module attributes {stable_mosaic.version = 11 : i64} {
  func.func @_hbm_copy_kernel(%arg0: memref<24x32xf32, #tpu.memory_space<any>>, %arg1: memref<8x32xf32, #tpu.memory_space<any>>, %arg2: memref<16x32xf32, #tpu.memory_space<any>>, %arg3: memref<24x32xf32, #tpu.memory_space<any>>, %arg4: memref<8x32xf32, #tpu.memory_space<any>>, %arg5: memref<16x32xf32, #tpu.memory_space<any>>, %arg6: memref<3x!tpu.dma_semaphore, #tpu.memory_space<semaphore_mem>>) attributes {dimension_semantics = [], scalar_prefetch = 0 : i64, scratch_operands = 1 : i64, tpu.core_type = #tpu.core_type<tc>} {
    %c0_i32 = arith.constant 0 : i32
    %0 = tpu.memref_slice %arg6[%c0_i32] : memref<3x!tpu.dma_semaphore, #tpu.memory_space<semaphore_mem>> -> memref<1x!tpu.dma_semaphore, #tpu.memory_space<semaphore_mem>>
    %1 = tpu.memref_squeeze %0 : memref<1x!tpu.dma_semaphore, #tpu.memory_space<semaphore_mem>> -> memref<!tpu.dma_semaphore, #tpu.memory_space<semaphore_mem>>
    tpu.enqueue_dma source(%arg0 : memref<24x32xf32, #tpu.memory_space<any>>) target(%arg3 : memref<24x32xf32, #tpu.memory_space<any>>) target_semaphore(%1 : memref<!tpu.dma_semaphore, #tpu.memory_space<semaphore_mem>>)
    %c1_i32 = arith.constant 1 : i32
    %2 = tpu.memref_slice %arg6[%c1_i32] : memref<3x!tpu.dma_semaphore, #tpu.memory_space<semaphore_mem>> -> memref<1x!tpu.dma_semaphore, #tpu.memory_space<semaphore_mem>>
    %3 = tpu.memref_squeeze %2 : memref<1x!tpu.dma_semaphore, #tpu.memory_space<semaphore_mem>> -> memref<!tpu.dma_semaphore, #tpu.memory_space<semaphore_mem>>
    tpu.enqueue_dma source(%arg1 : memref<8x32xf32, #tpu.memory_space<any>>) target(%arg4 : memref<8x32xf32, #tpu.memory_space<any>>) target_semaphore(%3 : memref<!tpu.dma_semaphore, #tpu.memory_space<semaphore_mem>>)
    %c2_i32 = arith.constant 2 : i32
    %4 = tpu.memref_slice %arg6[%c2_i32] : memref<3x!tpu.dma_semaphore, #tpu.memory_space<semaphore_mem>> -> memref<1x!tpu.dma_semaphore, #tpu.memory_space<semaphore_mem>>
    %5 = tpu.memref_squeeze %4 : memref<1x!tpu.dma_semaphore, #tpu.memory_space<semaphore_mem>> -> memref<!tpu.dma_semaphore, #tpu.memory_space<semaphore_mem>>
    tpu.enqueue_dma source(%arg2 : memref<16x32xf32, #tpu.memory_space<any>>) target(%arg5 : memref<16x32xf32, #tpu.memory_space<any>>) target_semaphore(%5 : memref<!tpu.dma_semaphore, #tpu.memory_space<semaphore_mem>>)
    %c0_i32_0 = arith.constant 0 : i32
    %6 = tpu.memref_slice %arg6[%c0_i32_0] : memref<3x!tpu.dma_semaphore, #tpu.memory_space<semaphore_mem>> -> memref<1x!tpu.dma_semaphore, #tpu.memory_space<semaphore_mem>>
    %7 = tpu.memref_squeeze %6 : memref<1x!tpu.dma_semaphore, #tpu.memory_space<semaphore_mem>> -> memref<!tpu.dma_semaphore, #tpu.memory_space<semaphore_mem>>
    tpu.wait_dma2 semaphore(%7 : memref<!tpu.dma_semaphore, #tpu.memory_space<semaphore_mem>>) src(%arg0 : memref<24x32xf32, #tpu.memory_space<any>>) dst(%arg3 : memref<24x32xf32, #tpu.memory_space<any>>)
    %c1_i32_1 = arith.constant 1 : i32
    %8 = tpu.memref_slice %arg6[%c1_i32_1] : memref<3x!tpu.dma_semaphore, #tpu.memory_space<semaphore_mem>> -> memref<1x!tpu.dma_semaphore, #tpu.memory_space<semaphore_mem>>
    %9 = tpu.memref_squeeze %8 : memref<1x!tpu.dma_semaphore, #tpu.memory_space<semaphore_mem>> -> memref<!tpu.dma_semaphore, #tpu.memory_space<semaphore_mem>>
    tpu.wait_dma2 semaphore(%9 : memref<!tpu.dma_semaphore, #tpu.memory_space<semaphore_mem>>) src(%arg1 : memref<8x32xf32, #tpu.memory_space<any>>) dst(%arg4 : memref<8x32xf32, #tpu.memory_space<any>>)
    %c2_i32_2 = arith.constant 2 : i32
    %10 = tpu.memref_slice %arg6[%c2_i32_2] : memref<3x!tpu.dma_semaphore, #tpu.memory_space<semaphore_mem>> -> memref<1x!tpu.dma_semaphore, #tpu.memory_space<semaphore_mem>>
    %11 = tpu.memref_squeeze %10 : memref<1x!tpu.dma_semaphore, #tpu.memory_space<semaphore_mem>> -> memref<!tpu.dma_semaphore, #tpu.memory_space<semaphore_mem>>
    tpu.wait_dma2 semaphore(%11 : memref<!tpu.dma_semaphore, #tpu.memory_space<semaphore_mem>>) src(%arg2 : memref<16x32xf32, #tpu.memory_space<any>>) dst(%arg5 : memref<16x32xf32, #tpu.memory_space<any>>)
    return
  }
}

</mosaic_0001>

<bundles_post_ra>
// kernel: tpu_custom_call.1
= control target key start
LH: loop header
LB: loop body
LE: loop exit
PB: predicated region body
PF: predicated region fallthrough
CT: control target
= control target key end

     0   :  { %s77_s18 = smov [#allocation2]   ;;  %s78_s19 = smov 131072   ;;  %s130_s0 = inlined_call_operand.hbm [shape: f32[24,32], index: 0, kind: input, shape index: {}]   ;;  %s131_s3 = inlined_call_operand.hbm [shape: f32[24,32], index: 3, kind: output, shape index: {0}]   ;;  %s132_s1 = inlined_call_operand.hbm [shape: f32[8,32], index: 1, kind: input, shape index: {}]   ;;  %s133_s4 = inlined_call_operand.hbm [shape: f32[8,32], index: 4, kind: output, shape index: {1}]   ;;  %s134_s2 = inlined_call_operand.hbm [shape: f32[16,32], index: 2, kind: input, shape index: {}]   ;;  %s135_s5 = inlined_call_operand.hbm [shape: f32[16,32], index: 5, kind: output, shape index: {2}]  }
   0x1   :  { %s79_s20 = smov 0   ;;  %s80_s25 = smov [#allocation2 + $0x1]  }
   0x2   :  { %17 = dma.general %s130_s0, 384, %s131_s3, %s77_s18, %s78_s19, [#allocation4], %s79_s20, 0  }
   0x3   :  { %25 = dma.general %s132_s1, 128, %s133_s4, %s80_s25, %s78_s19, [#allocation6], %s79_s20, 0  }
   0x4   :  { %s81_s30 = smov [#allocation2 + $0x2]  }
   0x5   :  { %33 = dma.general %s134_s2, 256, %s135_s5, %s81_s30, %s78_s19, [#allocation8], %s79_s20, 0  }
   0x6   :  { %71 = dma.done.wait [#allocation2], 384 }
   0x7   :  { %72 = vsyncadd [#allocation2], 4294966912 }
   0x8   :  { %73 = dma.done.wait [#allocation2 + $0x1], 128 }
   0x9   :  { %74 = vsyncadd [#allocation2 + $0x1], 4294967168 }
   0xa   :  { %75 = dma.done.wait [#allocation2 + $0x2], 256 }
   0xb   :  { %76 = vsyncadd [#allocation2 + $0x2], 4294967040 }
   0xc   :  { %43 = vsyncmov [#allocation2] }
   0xf   :  { %s44_s0 = vpop.sfrf %43 }
  0x10   :  { %p63_p0 = scmp.ne.s32.totalorder %s44_s0, 0 }
  0x12   :  { %48 = shalt.err (%p63_p0)  }
  0x13   :  { %50 = vsyncmov [#allocation2 + $0x1] }
  0x16   :  { %s51_s1 = vpop.sfrf %50 }
  0x17   :  { %p64_p1 = scmp.ne.s32.totalorder %s51_s1, 0 }
  0x19   :  { %55 = shalt.err (%p64_p1)  }
  0x1a   :  { %57 = vsyncmov [#allocation2 + $0x2] }
  0x1d   :  { %s58_s3 = vpop.sfrf %57 }
  0x1e   :  { %p65_p2 = scmp.ne.s32.totalorder %s58_s3, 0 }
  0x20   :  { %62 = shalt.err (%p65_p2)  }

</bundles_post_ra>
